<compile_context>
chip_gen: v5e
topology: v5e:2x2
jax: 0.10.0
libtpu: 0.0.40
codegen_flags: <defaults>
</compile_context>

<pallas_src>
import jax
import jax.numpy as jnp
from jax.experimental import pallas as pl
from jax.experimental.pallas import tpu as pltpu


_NUM_ROW_GROUPS = 2            # leading 'parallel' axis (both TCs on v7x)
_VMEM_BUDGET_BYTES = 24 << 20  # tile-sizing budget, stays under the scoped limit
_VMEM_LIMIT_BYTES = 32 << 20   # explicit scoped-VMEM limit, <= physical on all gens
_TM_CAP = 512                  # ~85% of HBM roofline at >=512-row tiles


def _cdiv(a, b):
    return -(-a // b)


def _round_up(x, m):
    return ((x + m - 1) // m) * m


def _choose_tm(rows_per_group, d, in_itemsize):
    """Largest row tile that fits: 2 inputs x 2 pipeline buffers (input dtype)
    plus ~6 live f32 (tm, D) temporaries in the kernel body."""
    bytes_per_row = 4 * d * in_itemsize + 6 * d * 4
    tm = max(8, _VMEM_BUDGET_BYTES // max(bytes_per_row, 1))
    tm = min(tm, _TM_CAP, _round_up(rows_per_group, 8))
    return max(8, (tm // 8) * 8)


def _kl_kernel(x_ref, t_ref, o_ref, acc_ref):
    i = pl.program_id(1)

    @pl.when(i == 0)
    def _():
        acc_ref[...] = jnp.zeros_like(acc_ref)

    x = x_ref[...].astype(jnp.float32)   # (tm, D) pred logits
    t = t_ref[...].astype(jnp.float32)   # (tm, D) target logits

    # log-softmax pieces for the prediction.
    x_sh = x - jnp.max(x, axis=-1, keepdims=True)
    lse_x = jnp.log(jnp.sum(jnp.exp(x_sh), axis=-1, keepdims=True))

    # softmax pieces for the target.
    t_sh = t - jnp.max(t, axis=-1, keepdims=True)
    e_t = jnp.exp(t_sh)
    z_t = jnp.sum(e_t, axis=-1, keepdims=True)

    # Per-row KL (uses sum_j p_j == 1): no per-element divide, no full-size
    # log_p / log_q arrays.
    w_sum = jnp.sum(e_t * (t_sh - x_sh), axis=-1, keepdims=True)
    row_kl = w_sum / z_t + lse_x - jnp.log(z_t)      # (tm, 1)

    # Deferred reduction: accumulate per-row partials, collapse at the end.
    acc_ref[...] += row_kl

    @pl.when(i == pl.num_programs(1) - 1)
    def _():
        o_ref[...] = jnp.sum(acc_ref[...], axis=0, keepdims=True).reshape(1, 1, 1)


def kl_loss(pred_logits, target_logits, tm=None):
    """Pallas TPU implementation of KLLoss.forward.

    Equivalent to
      F.kl_div(log_softmax(input.view(-1, D)), softmax(target.view(-1, D)),
               reduction='batchmean')
    i.e. the total KL sum divided by the *flattened* row count (bsz*len),
    matching the PyTorch module (it reshapes before calling kl_div).
    """
    dim = pred_logits.shape[-1]
    x = pred_logits.reshape(-1, dim)
    t = target_logits.reshape(-1, dim)
    n_rows, d = x.shape

    p_groups = _NUM_ROW_GROUPS
    rows_per_group = _cdiv(n_rows, p_groups)
    if tm is None:
        tm = _choose_tm(rows_per_group, d, x.dtype.itemsize)
    tm = max(8, (int(tm) // 8) * 8)

    steps = _cdiv(n_rows, p_groups * tm)
    padded_rows = p_groups * steps * tm

    if padded_rows != n_rows:
        # Zero rows give uniform target softmax and a matching uniform shifted
        # prediction, so they contribute exactly 0 to the KL sum.
        pad = padded_rows - n_rows
        x = jnp.pad(x, ((0, pad), (0, 0)))
        t = jnp.pad(t, ((0, pad), (0, 0)))

    def row_map(p_idx, i):
        return (p_idx * steps + i, 0)

    partials = pl.pallas_call(
        _kl_kernel,
        out_shape=jax.ShapeDtypeStruct((p_groups, 1, 1), jnp.float32),
        grid_spec=pltpu.PrefetchScalarGridSpec(
            num_scalar_prefetch=0,
            grid=(p_groups, steps),
            in_specs=[
                pl.BlockSpec((tm, d), row_map),
                pl.BlockSpec((tm, d), row_map),
            ],
            out_specs=pl.BlockSpec((1, 1, 1), lambda p_idx, i: (p_idx, 0, 0)),
            scratch_shapes=[pltpu.VMEM((tm, 1), jnp.float32)],
        ),
        compiler_params=pltpu.CompilerParams(
            dimension_semantics=("parallel", "arbitrary"),
            vmem_limit_bytes=_VMEM_LIMIT_BYTES,
        ),
    )(x, t)

    # 'batchmean' over the true flattened row count (padded rows contribute 0).
    return jnp.sum(partials) / jnp.float32(n_rows)


def _kl_loss_ref(pred_logits, target_logits):
    """Pure-JAX reference mirroring F.kl_div(log_softmax(x), softmax(t), 'batchmean')."""
    dim = pred_logits.shape[-1]
    x = pred_logits.reshape(-1, dim).astype(jnp.float32)
    t = target_logits.reshape(-1, dim).astype(jnp.float32)
    log_q = jax.nn.log_softmax(x, axis=-1)
    p = jax.nn.softmax(t, axis=-1)
    log_p = jax.nn.log_softmax(t, axis=-1)
    return jnp.sum(p * (log_p - log_q)) / x.shape[0]


if __name__ == "__main__":
    key = jax.random.PRNGKey(0)
    k1, k2, k3, k4 = jax.random.split(key, 4)

    # [bsz x len x dim] case from the module docstring.
    bsz, seq, dim = 2, 8, 32
    pred = jax.random.normal(k1, (bsz, seq, dim), dtype=jnp.float32)
    target = jax.random.normal(k2, (bsz, seq, dim), dtype=jnp.float32)

    loss = kl_loss(pred, target)
    jax.block_until_ready(loss)
    ref = _kl_loss_ref(pred, target)
    assert jnp.allclose(loss, ref, rtol=1e-5, atol=1e-5), (loss, ref)

    # Ragged flattened row count (exercises the zero-padding path).
    pred2 = jax.random.normal(k3, (3, 5, dim), dtype=jnp.float32)
    target2 = jax.random.normal(k4, (3, 5, dim), dtype=jnp.float32)
    loss2 = kl_loss(pred2, target2)
    jax.block_until_ready(loss2)
    ref2 = _kl_loss_ref(pred2, target2)
    assert jnp.allclose(loss2, ref2, rtol=1e-5, atol=1e-5), (loss2, ref2)

    print("KERNEL_OK")
</pallas_src>

<mosaic_0001>
module attributes {stable_mosaic.version = 11 : i64} {
  func.func @_kl_kernel(%arg0: i32, %arg1: i32, %arg2: memref<8x32xf32, #tpu.memory_space<vmem>>, %arg3: memref<8x32xf32, #tpu.memory_space<vmem>>, %arg4: memref<1x1x1xf32, #tpu.memory_space<vmem>>, %arg5: memref<8x1xf32, #tpu.memory_space<vmem>>) attributes {dimension_semantics = [#tpu.dimension_semantics<parallel>, #tpu.dimension_semantics<arbitrary>], iteration_bounds = array<i64: 2, 1>, scalar_prefetch = 0 : i64, scratch_operands = 1 : i64, tpu.core_type = #tpu.core_type<tc>, window_params = [{transform_indices = @transform_0, window_bounds = array<i64: 8, 32>}, {transform_indices = @transform_1, window_bounds = array<i64: 8, 32>}, {transform_indices = @transform_2, window_bounds = array<i64: 1, 1, 1>}]} {
    %c0_i32 = arith.constant 0 : i32
    %0 = arith.cmpi eq, %arg1, %c0_i32 : i32
    %1 = arith.extui %0 : i1 to i32
    %c0_i32_0 = arith.constant 0 : i32
    %2 = arith.cmpi ne, %1, %c0_i32_0 : i32
    scf.if %2 {
      %cst_14 = arith.constant 0.000000e+00 : f32
      %34 = vector.broadcast %cst_14 : f32 to vector<8x1xf32>
      %c0_15 = arith.constant 0 : index
      %c0_16 = arith.constant 0 : index
      %35 = vector.load %arg5[%c0_15, %c0_16] : memref<8x1xf32, #tpu.memory_space<vmem>>, vector<8x1xf32>
      tpu.vector_store %arg5[%c0_15, %c0_16], %34 {strides = array<i32>} : memref<8x1xf32, #tpu.memory_space<vmem>>, vector<8x1xf32>,
    } else {
    }
    %c0 = arith.constant 0 : index
    %c0_1 = arith.constant 0 : index
    %3 = vector.load %arg2[%c0, %c0_1] : memref<8x32xf32, #tpu.memory_space<vmem>>, vector<8x32xf32>
    %c0_2 = arith.constant 0 : index
    %c0_3 = arith.constant 0 : index
    %4 = vector.load %arg3[%c0_2, %c0_3] : memref<8x32xf32, #tpu.memory_space<vmem>>, vector<8x32xf32>
    %cst = arith.constant dense<0xFF800000> : vector<8xf32>
    %5 = vector.multi_reduction <maximumf>, %3, %cst [1] : vector<8x32xf32> to vector<8xf32>
    %6 = vector.shape_cast %5 : vector<8xf32> to vector<8x1xf32>
    %7 = vector.broadcast %6 : vector<8x1xf32> to vector<8x32xf32>
    %8 = arith.subf %3, %7 : vector<8x32xf32>
    %9 = math.exp %8 : vector<8x32xf32>
    %cst_4 = arith.constant dense<0.000000e+00> : vector<8xf32>
    %10 = vector.multi_reduction <add>, %9, %cst_4 [1] : vector<8x32xf32> to vector<8xf32>
    %11 = vector.shape_cast %10 : vector<8xf32> to vector<8x1xf32>
    %12 = math.log %11 : vector<8x1xf32>
    %cst_5 = arith.constant dense<0xFF800000> : vector<8xf32>
    %13 = vector.multi_reduction <maximumf>, %4, %cst_5 [1] : vector<8x32xf32> to vector<8xf32>
    %14 = vector.shape_cast %13 : vector<8xf32> to vector<8x1xf32>
    %15 = vector.broadcast %14 : vector<8x1xf32> to vector<8x32xf32>
    %16 = arith.subf %4, %15 : vector<8x32xf32>
    %17 = math.exp %16 : vector<8x32xf32>
    %cst_6 = arith.constant dense<0.000000e+00> : vector<8xf32>
    %18 = vector.multi_reduction <add>, %17, %cst_6 [1] : vector<8x32xf32> to vector<8xf32>
    %19 = vector.shape_cast %18 : vector<8xf32> to vector<8x1xf32>
    %20 = arith.subf %16, %8 : vector<8x32xf32>
    %21 = arith.mulf %17, %20 : vector<8x32xf32>
    %cst_7 = arith.constant dense<0.000000e+00> : vector<8xf32>
    %22 = vector.multi_reduction <add>, %21, %cst_7 [1] : vector<8x32xf32> to vector<8xf32>
    %23 = vector.shape_cast %22 : vector<8xf32> to vector<8x1xf32>
    %24 = arith.divf %23, %19 : vector<8x1xf32>
    %25 = arith.addf %24, %12 : vector<8x1xf32>
    %26 = math.log %19 : vector<8x1xf32>
    %27 = arith.subf %25, %26 : vector<8x1xf32>
    %c0_8 = arith.constant 0 : index
    %c0_9 = arith.constant 0 : index
    %28 = vector.load %arg5[%c0_8, %c0_9] : memref<8x1xf32, #tpu.memory_space<vmem>>, vector<8x1xf32>
    %29 = arith.addf %28, %27 : vector<8x1xf32>
    %c0_10 = arith.constant 0 : index
    %c0_11 = arith.constant 0 : index
    %30 = vector.load %arg5[%c0_10, %c0_11] : memref<8x1xf32, #tpu.memory_space<vmem>>, vector<8x1xf32>
    tpu.vector_store %arg5[%c0_10, %c0_11], %29 {strides = array<i32>} : memref<8x1xf32, #tpu.memory_space<vmem>>, vector<8x1xf32>,
    %c0_i32_12 = arith.constant 0 : i32
    %31 = arith.cmpi eq, %arg1, %c0_i32_12 : i32
    %32 = arith.extui %31 : i1 to i32
    %c0_i32_13 = arith.constant 0 : i32
    %33 = arith.cmpi ne, %32, %c0_i32_13 : i32
    scf.if %33 {
      %c0_14 = arith.constant 0 : index
      %c0_15 = arith.constant 0 : index
      %34 = vector.load %arg5[%c0_14, %c0_15] : memref<8x1xf32, #tpu.memory_space<vmem>>, vector<8x1xf32>
      %cst_16 = arith.constant dense<0.000000e+00> : vector<1xf32>
      %35 = vector.multi_reduction <add>, %34, %cst_16 [0] : vector<8x1xf32> to vector<1xf32>
      %36 = vector.shape_cast %35 : vector<1xf32> to vector<1x1xf32>
      %37 = vector.shape_cast %36 : vector<1x1xf32> to vector<1x1x1xf32>
      %c0_17 = arith.constant 0 : index
      %c0_18 = arith.constant 0 : index
      %c0_19 = arith.constant 0 : index
      %38 = vector.load %arg4[%c0_17, %c0_18, %c0_19] : memref<1x1x1xf32, #tpu.memory_space<vmem>>, vector<1x1x1xf32>
      tpu.vector_store %arg4[%c0_17, %c0_18, %c0_19], %37 {strides = array<i32>} : memref<1x1x1xf32, #tpu.memory_space<vmem>>, vector<1x1x1xf32>,
    } else {
    }
    return
  }
  func.func @transform_0(%arg0: i32, %arg1: i32) -> (i32, i32) {
    %c1_i32 = arith.constant 1 : i32
    %0 = arith.muli %arg0, %c1_i32 : i32
    %1 = arith.addi %0, %arg1 : i32
    %c0_i32 = arith.constant 0 : i32
    %c0_i32_0 = arith.constant 0 : i32
    return %1, %c0_i32 : i32, i32
  }
  func.func @transform_1(%arg0: i32, %arg1: i32) -> (i32, i32) {
    %c1_i32 = arith.constant 1 : i32
    %0 = arith.muli %arg0, %c1_i32 : i32
    %1 = arith.addi %0, %arg1 : i32
    %c0_i32 = arith.constant 0 : i32
    %c0_i32_0 = arith.constant 0 : i32
    return %1, %c0_i32 : i32, i32
  }
  func.func @transform_2(%arg0: i32, %arg1: i32) -> (i32, i32, i32) {
    %c0_i32 = arith.constant 0 : i32
    %c0_i32_0 = arith.constant 0 : i32
    %c0_i32_1 = arith.constant 0 : i32
    return %arg0, %c0_i32, %c0_i32_0 : i32, i32, i32
  }
}

</mosaic_0001>

<bundles_post_ra>
// kernel: tpu_custom_call.1
= control target key start
LH: loop header
LB: loop body
LE: loop exit
PB: predicated region body
PF: predicated region fallthrough
CT: control target
= control target key end

     0   :  { %7 = vsyncpa [#allocation4], 0  ;;  %s699_s0 = inlined_call_operand.hbm [shape: f32[16,32], index: 0, kind: input, shape index: {}]   ;;  %s700_s1 = inlined_call_operand.hbm [shape: f32[16,32], index: 1, kind: input, shape index: {}]   ;;  %s701_s2 = inlined_call_operand.vmem [shape: f32[2,1,1], index: 2, kind: output, shape index: {}]  }
   0x1   :  { %9 = vsyncpa [#allocation4 + $0x1], 0 }
   0x2   :  { %10 = vsyncpa [#allocation6], 0 }
   0x3   :  { %12 = vsyncpa [#allocation6 + $0x1], 0  ;;  %s596_s9 = smov 0   ;;  %s598_s10 = smov 0  }
   0x4   :  { %s600_s11 = smov 0   ;;  %s602_s12 = smov 0  }
   0x5   :  { %s604_s13 = smov 0   ;;  %s606_s14 = smov 0  }
   0x6 LB: > { %s380_s15 = sadd.s32 4294967295, %s578_s14   ;;  %s30_s16 = sadd.s32 1, %s574_s13  ;;  %s578_s14 = sphi %s606_s14, %s18_s14   ;;  %s574_s13 = sphi %s604_s13, %s708_s13   ;;  %s570_s12 = sphi %s602_s12, %s707_s12   ;;  %s566_s11 = sphi %s600_s11, %s706_s11   ;;  %s562_s10 = sphi %s598_s10, %s705_s10   ;;  %s558_s9 = sphi %s596_s9, %s704_s9  }
   0x7   : > { %p32_p0 = scmp.ge.s32.totalorder %s30_s16, 2  ;;  %s39_s17 = sadd.s32 1, %s566_s11 }
   0x8   : > { %p46_p1 = scmp.ne.s32.totalorder %s566_s11, %s562_s10  ;;  %p47_p2 = scmp.eq.s32.totalorder %s578_s14, 0 }
   0x9   : > { %s710_s16 = smov (%p32_p0, %s30_s16), 0  ;;  %p52_p4 = scmp.ne.s32.totalorder %s562_s10, %s558_s9 }
   0xa   : > { %p632_p3 = por %p47_p2, %p46_p1  ;;  %s36_s19 = ssub.s32 %s574_s13, %s710_s16 }
   0xb   : > { %p53_p5 = scmp.eq.s32.totalorder %s380_s15, 0  ;;  %p37_p6 = scmp.eq.s32.totalorder %s36_s19, 0 }
   0xc   : > { %p404_p8 = scmp.lt.s32.totalorder %s578_s14, 2  ;;  %s130_s22 = sand.u32 1, %s566_s11  }
   0xd   : > { %p639_p7 = por %p53_p5, %p52_p4  ;;  %s385_s23 = sshll.u32 %s574_s13, 3 }
   0xe   : > { %s645_s21 = scalar_select %p37_p6, %s566_s11, %s39_s17  }
   0xf   : > { %s384_s24 = sshll.u32 %s130_s22, 3  ;;  %s139_s27 = scalar_lea.hbm %s699_s0, %s385_s23 }
  0x10   : > { %s141_s28 = sshll.u32 %s139_s27, 4  ;;  %s134_s29 = scalar_lea.vmem [#allocation3], %s384_s24  ;;  %s142_s28 = int_to_ptr.hbm [resolvable:$true] %s141_s28 }
  0x11   : > { %s143_s30 = sshll.u32 %s134_s29, 4  ;;  %p398_p9 = pnand %p404_p8, %p632_p3  ;;  %s144_s30 = int_to_ptr.vmem [resolvable:$true] %s143_s30 }
  0x12   : > { %p388_p10 = scmp.ge.s32.totalorder %s578_s14, 1  ;;  %p168_p11 = scmp.lt.s32.totalorder %s578_s14, 3 }
  0x13   : > { %s131_s3 = scalar_lea.sflag [#allocation4], %s130_s22  ;;  %s159_s6 = scalar_lea.hbm %s700_s1, %s385_s23 }
  0x14   : > { %400 = dma.hbm_to_vmem [thread:$0]  (!%p398_p9), %s142_s28, 128, %s144_s30, %s131_s3  }
  0x15   : > { %p169_p12 = pnand %p388_p10, %p168_p11  ;;  %s161_s7 = sshll.u32 %s159_s6, 4  ;;  %s162_s7 = int_to_ptr.hbm [resolvable:$true] %s161_s7 }
  0x16   : > { %s154_s8 = scalar_lea.vmem [#allocation5], %s384_s24  ;;  %s151_s15 = scalar_lea.sflag [#allocation6], %s130_s22 }
  0x17   : > { %s163_s9 = sshll.u32 %s154_s8, 4  ;;  %172 = sbr.rel (%p169_p12) target bundleno = 324 (0x144), region = 28  ;;  %s164_s9 = int_to_ptr.vmem [resolvable:$true] %s163_s9 }
  0x18   : > { %403 = dma.hbm_to_vmem [thread:$0]  (!%p398_p9), %s162_s7, 128, %s164_s9, %s151_s15  }
  0x19   : > { %s174_s17 = sand.u32 (!%p169_p12), 1, %s562_s10  }
  0x1a   : > { %s389_s18 = sshll.u32 (!%p169_p12), %s174_s17, 3  ;;  %s175_s19 = scalar_lea.sflag (!%p169_p12), [#allocation4], %s174_s17 }
  0x1b   : > { %s178_s25 = scalar_lea.vmem (!%p169_p12), [#allocation3], %s389_s18 }
  0x1c   : > { %549 = dma.done.wait (%p639_p7), %s175_s19, 128  }
  0x1d   : > { %551 = vsyncadd (%p639_p7), %s175_s19, 4294967168  ;;  %s185_s23 = scalar_lea.sflag [#allocation6], %s174_s17  ;;  %s188_s24 = scalar_lea.vmem [#allocation5], %s389_s18 }
  0x1e   : > { %553 = dma.done.wait (%p639_p7), %s185_s23, 128  }
  0x1f   : > { %555 = vsyncadd (%p639_p7), %s185_s23, 4294967168  ;;  %vm222_vm0 = vcmask 7168   ;;  %v580_v0 = vmov 0.0   ;;  %vm226_vm1 = vcmask 261120   ;;  %v225_v1 = vld [vmem:[%s188_s24] sm:$0xff]  ;;  %v224_v3 = vld [vmem:[%s178_s25] sm:$0xff] }
  0x20   : > { %223 = vst.msk [vmem:[#allocation2] sm:$0xff] %vm222_vm0, %v580_v0  ;;  %v238_v2 = vsel %vm226_vm1, %v225_v1, -inf  ;;  %v227_v4 = vsel %vm226_vm1, %v224_v3, -inf  ;;  %p215_p13 = scmp.lt.s32.totalorder %s570_s12, 1  ;;  %vm286_vm6 = vcmask 0  }
  0x21   : > { %239 = vmax.xlane.f32.xlu0 %v238_v2 }
  0x22   : > { %s712_s12 = smov (!%p215_p13, %s570_s12), 1 }
  0x23   : > { %s217_s26 = scalar_lea.vmem %s701_s2, %s712_s12 }
  0x27   : > { %v271_v37 = vld [vmem:[#allocation2] sm:$0xff] }
  0x29   : > { %228 = vmax.xlane.f32.xlu0 %v227_v4 }
  0x94   : > { %v240_v5 = vpop.xlane.xlu0 %239 }
  0x95   : > { %v241_v6 = vsub.f32 %v225_v1, %v240_v5 }
  0x97   : > { %v242_v7 = vmul.f32 1.442695, %v241_v6 }
  0x99   : > { %454 = vpow2.f32 %v242_v7 }
  0x9c   : > { %v229_v8 = vpop.xlane.xlu0 %228 }
  0x9d   : > { %v230_v9 = vsub.f32 %v224_v3, %v229_v8 }
  0x9f   : > { %v455_v10 = vpop.eup %454  ;;  %v231_v11 = vmul.f32 1.442695, %v230_v9  ;;  %v247_v12 = vsub.f32 %v241_v6, %v230_v9 }
  0xa0   : > { %v244_v13 = vsel %vm226_vm1, %v455_v10, 0.0 }
  0xa1   : > { %456 = vpow2.f32 %v231_v11  ;;  %245 = vadd.xlane.f32.xlu1 %v244_v13  ;;  %v248_v14 = vmul.f32 %v455_v10, %v247_v12 }
  0xa3   : > { %v249_v15 = vsel %vm226_vm1, %v248_v14, 0.0 }
  0xa4   : > { %250 = vadd.xlane.f32.xlu2 %v249_v15 }
  0xa7   : > { %v457_v16 = vpop.eup %456 }
  0xa8   : > { %v233_v17 = vsel %vm226_vm1, %v457_v16, 0.0 }
  0xa9   : > { %234 = vadd.xlane.f32.xlu1 %v233_v17 }
 0x114   : > { %v246_v18 = vpop.xlane.xlu1 %245 }
 0x115   : > { %458 = vrcp.f32 %v246_v18  ;;  %v263_v23 = vand.u32 2147483648, %v246_v18  ;;  %v261_v25 = vand.u32 2147483647, %v246_v18  ;;  %vm257_vm3 = vweird.f32 %v246_v18 }
 0x117   : > { %v264_v28 = vor.u32 1.1754944e-38, %v263_v23  ;;  %vm262_vm5 = vcmp.eq.f32.partialorder %v261_v25, 8.507059e+37  ;;  %v251_v33 = vpop.xlane.xlu2 %250 }
 0x11b   : > { %v459_v19 = vpop.eup %458 }
 0x11c   : > { %v253_v20 = vmul.f32 %v459_v19, %v246_v18  ;;  %v235_v21 = vpop.xlane.xlu1 %234  ;;  %vm258_vm2 = vweird.f32 %v459_v19 }
 0x11d   : > { %460 = vlog2.f32 %v235_v21  ;;  %vm259_vm4 = vmor %vm257_vm3, %vm258_vm2 }
 0x11e   : > { %v254_v22 = vsub.f32 1.0, %v253_v20  ;;  %462 = vlog2.f32 %v246_v18 }
 0x120   : > { %v255_v24 = vmul.f32 %v459_v19, %v254_v22 }
 0x122   : > { %v256_v26 = vadd.f32 %v459_v19, %v255_v24 }
 0x123   : > { %v461_v27 = vpop.eup %460 }
 0x124   : > { %v260_v29 = vsel %vm259_vm4, %v459_v19, %v256_v26  ;;  %v237_v30 = vmul.f32 0.6931472, %v461_v27  ;;  %v463_v31 = vpop.eup %462 }
 0x125   : > { %v265_v32 = vsel %vm262_vm5, %v264_v28, %v260_v29  ;;  %v269_v35 = vmul.f32 0.6931472, %v463_v31 }
 0x126   : > { %v266_v34 = vmul.f32 %v265_v32, %v251_v33 }
 0x128   : > { %v267_v36 = vadd.f32 %v266_v34, %v237_v30 }
 0x12a   : > { %v270_v38 = vsub.f32 %v267_v36, %v269_v35 }
 0x12c   : > { %v272_v39 = vadd.f32 %v271_v37, %v270_v38 }
 0x12e   : > { %274 = vst.msk [vmem:[#allocation2] sm:$0xff] %vm222_vm0, %v272_v39 }
 0x135   : > { %v278_v40 = vld [vmem:[#allocation2] sm:$0xff] }
 0x136   : > { %v279_v41 = vsel %vm222_vm0, %v278_v40, 0.0 }
 0x137   : > { %v280_v42 = vrot.slane %v279_v41, 4 }
 0x139   : > { %v281_v43 = vadd.f32 %v280_v42, %v279_v41 }
 0x13b   : > { %v282_v44 = vrot.slane %v281_v43, 2 }
 0x13d   : > { %v283_v45 = vadd.f32 %v282_v44, %v281_v43 }
 0x13f   : > { %v284_v46 = vrot.slane %v283_v45, 1 }
 0x141   : > { %v285_v47 = vadd.f32 %v284_v46, %v283_v45 }
 0x143   : > { %287 = vst.msk [vmem:[%s217_s26] sm:$0x1] %vm286_vm6, %v285_v47 }
 0x144 PF: > { %s18_s14 = sadd.s32 1, %s578_s14   ;;  %s704_s9 = smov %s562_s10 }
 0x145   : > { %p15_p0 = scmp.ge.s32.totalorder %s18_s14, 4   ;;  %s705_s10 = smov %s566_s11 }
 0x146   : > { %s706_s11 = smov %s645_s21  ;;  %s707_s12 = smov %s574_s13 }
 0x147   : > { %s708_s13 = smov %s710_s16  ;;  %17 = sbr.rel (!%p15_p0) target bundleno = 6 (0x6), region = 89 }
 0x14c   :  { %305 = vsyncpa [#allocation4], 1 }
 0x14d   :  { %307 = vsyncpa [#allocation4 + $0x1], 1 }
 0x14e   :  { %308 = vsyncpa [#allocation6], 1 }
 0x14f   :  { %310 = vsyncpa [#allocation6 + $0x1], 1 }

</bundles_post_ra>
